<compile_context>
chip_gen: v7x
topology: tpu7x:2x2x1
jax: 0.10.0
libtpu: 0.0.40
codegen_flags: <defaults>
</compile_context>

<pallas_src>
import functools
from typing import NamedTuple

import jax
import jax.numpy as jnp
from jax.experimental import pallas as pl
from jax.experimental.pallas import tpu as pltpu


def _round_up(x, m):
    return ((x + m - 1) // m) * m


def _tpu_defaults():
    """(tm_max, tn_default, vmem_cap_bytes) per TPU generation."""
    vmem_cap = None
    try:
        vmem_cap = int(getattr(pltpu.get_tpu_info(), "vmem_capacity_bytes", 0)) or None
    except Exception:
        vmem_cap = None
    try:
        kind = jax.devices()[0].device_kind.lower()
    except Exception:
        kind = ""
    if "v7" in kind:
        # 64 MiB VMEM: keep tn modest, push tm towards the ~310 FLOP/byte balance.
        return 512, 768, vmem_cap or (64 << 20)
    if "v6" in kind:
        # ~640 FLOP/byte balance point -> tm=512; 128 MiB VMEM fits tn=1024 easily.
        return 512, 1024, vmem_cap or (128 << 20)
    if "v5" in kind:
        # v5e knee is ~240 FLOP/byte: tm=256 suffices; win is fewer grid steps (big tn).
        return 256, 1024, vmem_cap or (128 << 20)
    return 256, 512, vmem_cap or (64 << 20)


class PreparedFFNWeights(NamedTuple):
    w13: jax.Array      # (dim, n_hid * 2 * tn)  fused, compute-dtype, hidden-padded
    w2: jax.Array       # (Hp, dim)              compute-dtype, hidden-padded
    dim: int
    hidden: int
    tn: int
    n_hid: int


def prepare_ffn_weights(w1, w2, w3, *, tn=None, compute_dtype=jnp.bfloat16):
    """One-time weight preparation (do this at weight-load/init time and cache).

    w1, w3 : (dim, hidden)   transposed nn.Linear layout
    w2     : (hidden, dim)
    """
    dim, hidden = w1.shape
    if tn is None:
        _, tn, _ = _tpu_defaults()
    tn = min(tn, _round_up(hidden, 128))
    Hp = _round_up(hidden, tn)
    n_hid = Hp // tn

    w1c = w1.astype(compute_dtype)
    w3c = w3.astype(compute_dtype)
    w2c = w2.astype(compute_dtype)
    if Hp != hidden:
        # Padding hidden is numerically benign: silu(0) * 0 == 0 and the padded
        # w2 rows are zero.
        w1c = jnp.pad(w1c, ((0, 0), (0, Hp - hidden)))
        w3c = jnp.pad(w3c, ((0, 0), (0, Hp - hidden)))
        w2c = jnp.pad(w2c, ((0, Hp - hidden), (0, 0)))

    # Fuse per hidden tile: columns [j*2*tn : (j+1)*2*tn] = [w1_j | w3_j] so one
    # x tile drives one wide MXU pass per hidden step.
    w13 = jnp.concatenate(
        [w1c.reshape(dim, n_hid, tn), w3c.reshape(dim, n_hid, tn)],
        axis=2).reshape(dim, n_hid * 2 * tn)

    return PreparedFFNWeights(w13=w13, w2=w2c, dim=dim, hidden=hidden,
                              tn=tn, n_hid=n_hid)


def _ffn_kernel(x_ref, w13_ref, w2_ref, o_ref, *scratch, tn):
    # x_ref:   (tm, dim)       token tile in its ORIGINAL dtype (cast in-kernel)
    # w13_ref: (dim, 2*tn)     fused [w1_tile | w3_tile] for this hidden slice
    # w2_ref:  (tn, dim)       down-projection tile for this hidden slice
    # o_ref:   (tm, dim)       output tile (resident across hidden steps)
    # scratch: optional (tm, dim) f32 accumulator (only for non-f32 outputs)
    acc_ref = scratch[0] if scratch else o_ref
    j = pl.program_id(1)

    @pl.when(j == 0)
    def _init():
        acc_ref[...] = jnp.zeros_like(acc_ref)

    x = x_ref[...].astype(w13_ref.dtype)
    # One wide MXU pass computes both up-projections for this hidden tile.
    h = jnp.dot(x, w13_ref[...], preferred_element_type=jnp.float32)  # (tm, 2*tn)
    h1 = h[:, :tn]
    h3 = h[:, tn:]
    # SiLU gate in f32 on the VPU/EUP (filler slots under the MXU).
    gated = (h1 * jax.nn.sigmoid(h1)) * h3
    acc_ref[...] += jnp.dot(gated.astype(w2_ref.dtype), w2_ref[...],
                            preferred_element_type=jnp.float32)

    if scratch:  # narrow output dtype: cast/store from the f32 scratch at the end
        @pl.when(j == pl.num_programs(1) - 1)
        def _store():
            o_ref[...] = acc_ref[...].astype(o_ref.dtype)


def feed_forward(x, w1=None, w2=None, w3=None, *, prepared=None, tm=None, tn=None,
                 compute_dtype=jnp.bfloat16):
    """SwiGLU FFN: w2(silu(x @ w1) * (x @ w3)).

    Either pass raw (w1, w2, w3) — prepared on the fly — or pass a cached
    `prepared = prepare_ffn_weights(...)` (recommended: prepare once at init).
    """
    if prepared is None:
        prepared = prepare_ffn_weights(w1, w2, w3, tn=tn, compute_dtype=compute_dtype)

    B, S, dim = x.shape
    assert dim == prepared.dim, "x feature dim does not match prepared weights"
    hidden, tn, n_hid = prepared.hidden, prepared.tn, prepared.n_hid
    out_dtype = x.dtype

    tm_max, _, vmem_cap = _tpu_defaults()
    if tm is not None:
        tm_max = tm

    T = B * S
    # Balance the token tiles: pick the smallest tm that still covers T in
    # ceil(T / tm_max) tiles, so a ragged prefill doesn't run a mostly-padded
    # extra weight stream.
    n_tok = max(1, -(-T // tm_max))
    tm = _round_up(-(-T // n_tok), 16)
    Tp = n_tok * tm

    xp = x.reshape(T, dim)
    if Tp != T:
        xp = jnp.pad(xp, ((0, Tp - T), (0, 0)))

    use_acc = out_dtype != jnp.float32
    scratch_shapes = [pltpu.VMEM((tm, dim), jnp.float32)] if use_acc else []

    bytes_c = jnp.dtype(compute_dtype).itemsize
    bytes_x = jnp.dtype(x.dtype).itemsize
    bytes_o = jnp.dtype(out_dtype).itemsize
    # Per-step VMEM: double-buffered streamed weight tiles + x/out tiles
    # + optional f32 accumulator + f32 intermediates (h, gated).
    vmem_need = (2 * (dim * 2 * tn + tn * dim) * bytes_c
                 + 2 * tm * dim * bytes_x
                 + 2 * tm * dim * bytes_o
                 + (tm * dim * 4 if use_acc else 0)
                 + 3 * tm * 2 * tn * 4)
    vmem_limit = max(32 << 20, int(1.3 * vmem_need))
    vmem_limit = min(vmem_limit, vmem_cap - (2 << 20))  # never exceed physical VMEM

    cost = pl.CostEstimate(
        flops=int(6 * T * dim * hidden),
        transcendentals=int(T * hidden),
        # Weights are re-streamed once per token tile.
        bytes_accessed=int(T * dim * bytes_x
                           + n_tok * 3 * dim * hidden * bytes_c
                           + T * dim * bytes_o),
    )

    out2 = pl.pallas_call(
        functools.partial(_ffn_kernel, tn=tn),
        out_shape=jax.ShapeDtypeStruct((Tp, dim), out_dtype),
        grid_spec=pltpu.PrefetchScalarGridSpec(
            num_scalar_prefetch=0,
            grid=(n_tok, n_hid),                                   # hidden axis last
            in_specs=[
                pl.BlockSpec((tm, dim), lambda i, j: (i, 0)),      # x tile
                pl.BlockSpec((dim, 2 * tn), lambda i, j: (0, j)),  # fused [w1|w3] tile
                pl.BlockSpec((tn, dim), lambda i, j: (j, 0)),      # w2 tile
            ],
            out_specs=pl.BlockSpec((tm, dim), lambda i, j: (i, 0)),
            scratch_shapes=scratch_shapes,
        ),
        compiler_params=pltpu.CompilerParams(
            dimension_semantics=("parallel", "arbitrary"),
            vmem_limit_bytes=vmem_limit),
        cost_estimate=cost,
    )(xp, prepared.w13, prepared.w2)

    return out2[:T].reshape(B, S, dim)


def feed_forward_ref(x, w1, w2, w3):
    h1 = x @ w1
    h3 = x @ w3
    return (jax.nn.silu(h1) * h3) @ w2


if __name__ == "__main__":
    # Small shapes consistent with the module; hidden > tn so the hidden-tiled
    # accumulation path (2 hidden steps) is exercised.
    B, S, DIM, HIDDEN = 2, 8, 256, 1024

    key = jax.random.PRNGKey(0)
    kx, k1, k2, k3 = jax.random.split(key, 4)

    x = jax.random.normal(kx, (B, S, DIM), dtype=jnp.float32)
    # Deterministic "Linear" weights, stored as (in, out) = transposed PyTorch layout.
    w1 = jax.random.normal(k1, (DIM, HIDDEN), dtype=jnp.float32) * 0.02
    w3 = jax.random.normal(k3, (DIM, HIDDEN), dtype=jnp.float32) * 0.02
    w2 = jax.random.normal(k2, (HIDDEN, DIM), dtype=jnp.float32) * 0.02

    # Prepare (cast / pad / fuse) the weights ONCE — this is the cached-init path.
    prepared = prepare_ffn_weights(w1, w2, w3, tn=512)

    # f32 input -> f32 output (accumulate-in-place path, no VMEM scratch).
    out = feed_forward(x, prepared=prepared)
    out = jax.block_until_ready(out)
    assert out.shape == (B, S, DIM)

    # Reference computed from the bf16-rounded inputs (same data the kernel sees),
    # accumulated in f32 — matches the kernel's numerics.
    def q(a):
        return a.astype(jnp.bfloat16).astype(jnp.float32)

    ref = feed_forward_ref(q(x), q(w1), q(w2), q(w3))
    assert jnp.allclose(out.astype(jnp.float32), ref, atol=2e-2, rtol=2e-2), \
        "mismatch vs reference (f32 path)"

    # bf16 input -> bf16 output (f32 scratch accumulator path).
    out_bf16 = feed_forward(x.astype(jnp.bfloat16), prepared=prepared)
    out_bf16 = jax.block_until_ready(out_bf16)
    assert out_bf16.shape == (B, S, DIM) and out_bf16.dtype == jnp.bfloat16
    assert jnp.allclose(out_bf16.astype(jnp.float32), ref, atol=3e-2, rtol=3e-2), \
        "mismatch vs reference (bf16 path)"

    print("KERNEL_OK")
</pallas_src>

<mosaic_0001>
module attributes {stable_mosaic.version = 11 : i64} {
  func.func @_ffn_kernel(%arg0: i32, %arg1: i32, %arg2: memref<16x256xf32, #tpu.memory_space<vmem>>, %arg3: memref<256x1024xbf16, #tpu.memory_space<vmem>>, %arg4: memref<512x256xbf16, #tpu.memory_space<vmem>>, %arg5: memref<16x256xf32, #tpu.memory_space<vmem>>) attributes {dimension_semantics = [#tpu.dimension_semantics<parallel>, #tpu.dimension_semantics<arbitrary>], iteration_bounds = array<i64: 1, 2>, scalar_prefetch = 0 : i64, scratch_operands = 0 : i64, tpu.core_type = #tpu.core_type<tc>, window_params = [{transform_indices = @transform_0, window_bounds = array<i64: 16, 256>}, {transform_indices = @transform_1, window_bounds = array<i64: 256, 1024>}, {transform_indices = @transform_2, window_bounds = array<i64: 512, 256>}, {transform_indices = @transform_3, window_bounds = array<i64: 16, 256>}]} {
    %c0_i32 = arith.constant 0 : i32
    %0 = arith.cmpi eq, %arg1, %c0_i32 : i32
    %1 = arith.extui %0 : i1 to i32
    %c0_i32_0 = arith.constant 0 : i32
    %2 = arith.cmpi ne, %1, %c0_i32_0 : i32
    scf.if %2 {
      %cst_12 = arith.constant 0.000000e+00 : f32
      %22 = vector.broadcast %cst_12 : f32 to vector<16x256xf32>
      %c0_13 = arith.constant 0 : index
      %c0_14 = arith.constant 0 : index
      %23 = vector.load %arg5[%c0_13, %c0_14] : memref<16x256xf32, #tpu.memory_space<vmem>>, vector<16x256xf32>
      tpu.vector_store %arg5[%c0_13, %c0_14], %22 {strides = array<i32>} : memref<16x256xf32, #tpu.memory_space<vmem>>, vector<16x256xf32>,
    } else {
    }
    %c0 = arith.constant 0 : index
    %c0_1 = arith.constant 0 : index
    %3 = vector.load %arg2[%c0, %c0_1] : memref<16x256xf32, #tpu.memory_space<vmem>>, vector<16x256xf32>
    %4 = arith.truncf %3 : vector<16x256xf32> to vector<16x256xbf16>
    %c0_2 = arith.constant 0 : index
    %c0_3 = arith.constant 0 : index
    %5 = vector.load %arg3[%c0_2, %c0_3] : memref<256x1024xbf16, #tpu.memory_space<vmem>>, vector<256x1024xbf16>
    %cst = arith.constant dense<0.000000e+00> : vector<16x1024xf32>
    %6 = tpu.matmul %4, %5, %cst {dimension_numbers = #tpu.dot_dimension_numbers<[1], [0], [0], [1], [0, 0, 1, 1], [], []>} : vector<16x256xbf16>, vector<256x1024xbf16>, vector<16x1024xf32> -> vector<16x1024xf32>
    %7 = vector.extract_strided_slice %6 {offsets = [0, 0], sizes = [16, 512], strides = [1, 1]} : vector<16x1024xf32> to vector<16x512xf32>
    %8 = vector.extract_strided_slice %6 {offsets = [0, 512], sizes = [16, 512], strides = [1, 1]} : vector<16x1024xf32> to vector<16x512xf32>
    %9 = arith.negf %7 : vector<16x512xf32>
    %10 = math.exp %9 : vector<16x512xf32>
    %cst_4 = arith.constant 1.000000e+00 : f32
    %11 = vector.broadcast %cst_4 : f32 to vector<16x512xf32>
    %12 = arith.addf %11, %10 : vector<16x512xf32>
    %13 = arith.divf %11, %12 : vector<16x512xf32>
    %14 = arith.mulf %7, %13 : vector<16x512xf32>
    %15 = arith.mulf %14, %8 : vector<16x512xf32>
    %c0_5 = arith.constant 0 : index
    %c0_6 = arith.constant 0 : index
    %16 = vector.load %arg5[%c0_5, %c0_6] : memref<16x256xf32, #tpu.memory_space<vmem>>, vector<16x256xf32>
    %17 = arith.truncf %15 : vector<16x512xf32> to vector<16x512xbf16>
    %c0_7 = arith.constant 0 : index
    %c0_8 = arith.constant 0 : index
    %18 = vector.load %arg4[%c0_7, %c0_8] : memref<512x256xbf16, #tpu.memory_space<vmem>>, vector<512x256xbf16>
    %cst_9 = arith.constant dense<0.000000e+00> : vector<16x256xf32>
    %19 = tpu.matmul %17, %18, %cst_9 {dimension_numbers = #tpu.dot_dimension_numbers<[1], [0], [0], [1], [0, 0, 1, 1], [], []>} : vector<16x512xbf16>, vector<512x256xbf16>, vector<16x256xf32> -> vector<16x256xf32>
    %20 = arith.addf %16, %19 : vector<16x256xf32>
    %c0_10 = arith.constant 0 : index
    %c0_11 = arith.constant 0 : index
    %21 = vector.load %arg5[%c0_10, %c0_11] : memref<16x256xf32, #tpu.memory_space<vmem>>, vector<16x256xf32>
    tpu.vector_store %arg5[%c0_10, %c0_11], %20 {strides = array<i32>} : memref<16x256xf32, #tpu.memory_space<vmem>>, vector<16x256xf32>,
    return
  }
  func.func @transform_0(%arg0: i32, %arg1: i32) -> (i32, i32) {
    %c0_i32 = arith.constant 0 : i32
    %c0_i32_0 = arith.constant 0 : i32
    return %arg0, %c0_i32 : i32, i32
  }
  func.func @transform_1(%arg0: i32, %arg1: i32) -> (i32, i32) {
    %c0_i32 = arith.constant 0 : i32
    %c0_i32_0 = arith.constant 0 : i32
    return %c0_i32, %arg1 : i32, i32
  }
  func.func @transform_2(%arg0: i32, %arg1: i32) -> (i32, i32) {
    %c0_i32 = arith.constant 0 : i32
    %c0_i32_0 = arith.constant 0 : i32
    return %arg1, %c0_i32 : i32, i32
  }
  func.func @transform_3(%arg0: i32, %arg1: i32) -> (i32, i32) {
    %c0_i32 = arith.constant 0 : i32
    %c0_i32_0 = arith.constant 0 : i32
    return %arg0, %c0_i32 : i32, i32
  }
}

</mosaic_0001>

<bundles_post_ra>
// kernel: tpu_custom_call.1
= control target key start
LH: loop header
LB: loop body
LE: loop exit
PB: predicated region body
PF: predicated region fallthrough
CT: control target
= control target key end

     0   :  { %8 = vsyncpa [#allocation3], 0  ;;  %s2955_s0 = inlined_call_operand.hbm [shape: f32[16,256], index: 0, kind: input, shape index: {}]   ;;  %s2956_s1 = inlined_call_operand.hbm [shape: bf16[256,2048], index: 1, kind: input, shape index: {}]   ;;  %s2957_s2 = inlined_call_operand.hbm [shape: bf16[1024,256], index: 2, kind: input, shape index: {}]   ;;  %s2958_s3 = inlined_call_operand.hbm [shape: f32[16,256], index: 3, kind: output, shape index: {}]  }
   0x1   :  { %9 = vsyncpa [#allocation6], 0 }
   0x2   :  { %11 = vsyncpa [#allocation6 + $0x1], 0 }
   0x3   :  { %12 = vsyncpa [#allocation4], 0  ;;  %s2523_s12 = smov 0   ;;  %s2525_s13 = smov 0  }
   0x4   :  { %s2527_s14 = smov 0   ;;  %s2529_s15 = smov 0  }
   0x5   :  { %s2531_s16 = smov 0   ;;  %s2533_s17 = smov 0  }
   0x6 LB: > { %s27_s18 = sadd.s32 1, %s2483_s16  ;;  %s63_s19 = sadd.s32 1, %s2475_s14  ;;  %s2487_s17 = sphi %s2533_s17, %s18_s17   ;;  %s2483_s16 = sphi %s2531_s16, %s2980_s16   ;;  %s2479_s15 = sphi %s2529_s15, %s2979_s15   ;;  %s2475_s14 = sphi %s2527_s14, %s2978_s14   ;;  %s2471_s13 = sphi %s2525_s13, %s2977_s13   ;;  %s2467_s12 = sphi %s2523_s12, %s2976_s12  }
   0x7   : > { %p28_p0 = scmp.ge.s32.totalorder %s27_s18, 2  ;;  %p70_p1 = scmp.ne.s32.totalorder %s2475_s14, %s2471_s13 }
   0x8   : > { %p71_p2 = scmp.eq.s32.totalorder %s2487_s17, 0  ;;  %p2123_p4 = scmp.lt.s32.totalorder %s2487_s17, 2 }
   0x9   : > { %s2982_s18 = smov (%p28_p0, %s27_s18), 0  ;;  %s169_s21 = sand.u32 1, %s2487_s17  }
   0xa   : > { %p72_p3 = por %p71_p2, %p70_p1  ;;  %s60_s20 = ssub.s32 %s2483_s16, %s2982_s18 }
   0xb   : > { %p61_p5 = scmp.eq.s32.totalorder %s60_s20, 0  ;;  %s171_s22 = sand.u32 1, %s2475_s14  }
   0xc   : > { %s2092_s23 = sshll.u32 %s2483_s16, 9  ;;  %s1876_s25 = sshll.u32 %s171_s22, 10 }
   0xd   : > { %s2567_s24 = scalar_select %p61_p5, %s2475_s14, %s63_s19  }
   0xe   : > { %s2574_s28 = scalar_lea.hbm %s2956_s1, %s2092_s23  ;;  %p2576_p6 = pnand %p2123_p4, %p72_p3 }
   0xf   : > { %s173_s30 = scalar_lea.vmem [#allocation5], %s1876_s25  ;;  %s2582_s5 = scalar_lea.sflag [#allocation6], %s169_s21 }
  0x10   : > { %s2965_s29 = scalar_select %p2576_p6, 1, 0 }
  0x11   : > { %s180_s4 = sshll.u32 %s173_s30, 4  ;;  %s2315_s6 = scalar_lea.hbm %s2574_s28, 16384  ;;  %s2580_s4 = int_to_ptr.vmem [resolvable:$true] %s180_s4 }
  0x12   : > { %p2316_p7 = scmp.ne.s32.totalorder %s2574_s28, %s2315_s6  ;;  %p2960_p8 = pneg %p2576_p6 }
  0x13   : > { %s2320_s9 = scalar_lea.hbm %s2956_s1, 32768  ;;  %p2321_p11 = scmp.lt.u32.totalorder %s2574_s28, %s2956_s1 }
  0x14   : > { %p2318_p9 = pnand %p2960_p8, %p2316_p7  ;;  %p2322_p12 = scmp.lt.u32.totalorder %s2320_s9, %s2315_s6 }
  0x15   : > { %p2324_p0 = scmp.lt.u32.totalorder %s2315_s6, %s2574_s28 }
  0x16   : > { %p2319_p10 = pneg %p2318_p9  ;;  %p2323_p13 = por %p2322_p12, %p2321_p11 }
  0x18   : > { %p2325_p1 = por %p2324_p0, %p2323_p13 }
  0x1a   : > { %p2326_p2 = pnand %p2325_p1, %p2319_p10 }
  0x1c   : > { %2329 = shalt.err (!%p2326_p2)
}
  0x1d   : > { %s2330_s19 = scalar_lea.vmem %s2580_s4, 16384  ;;  %s2489_s20 = smov [#allocation5]  }
  0x1e   : > { %p2331_p3 = scmp.ne.s32.totalorder %s2580_s4, %s2330_s19  ;;  %s2335_s21 = sshll.u32 %s2489_s20, 4  ;;  %s2336_s21 = int_to_ptr.vmem [resolvable:$false] %s2335_s21 }
  0x1f   : > { %s2337_s23 = scalar_lea.vmem %s2336_s21, 32768  ;;  %p2338_p7 = scmp.lt.s32.totalorder %s2580_s4, %s2336_s21 }
  0x20   : > { %p2333_p4 = pnand %p2331_p3, %p2960_p8  ;;  %p2339_p9 = scmp.lt.s32.totalorder %s2337_s23, %s2330_s19 }
  0x22   : > { %p2334_p5 = pneg %p2333_p4  ;;  %p2340_p11 = por %p2339_p9, %p2338_p7 }
  0x24   : > { %p2341_p12 = pnand %p2340_p11, %p2334_p5 }
  0x26   : > { %2344 = shalt.err (!%p2341_p12)
}
  0x27   : > { %s2490_s25 = smov 1024   ;;  %s2491_s26 = smov 512  }
  0x28   : > { %s2492_s27 = smov 32   ;;  %s2611_s30 = sadd.s32 4294967295, %s2487_s17  }
  0x29   : > { %2118 = dma.hbm_to_vmem [thread:$0]  (!%p2576_p6), %s2574_s28, 16384, %s2580_s4, %s2582_s5, %s2490_s25, %s2491_s26, %s2492_s27  }
  0x2a   : > { %p76_p10 = scmp.ne.s32.totalorder %s2471_s13, %s2467_s12  ;;  %p2959_p13 = scmp.eq.s32.totalorder %s2611_s30, 0 }
  0x2b   : > { %p1873_p0 = scmp.ge.s32.totalorder %s2487_s17, 1  ;;  %p139_p1 = scmp.lt.s32.totalorder %s2487_s17, 3 }
  0x2c   : > { %p2620_p2 = por %p2959_p13, %p76_p10  ;;  %s2493_s28 = smov [#allocation2]  }
  0x2d   : > { %p2624_p3 = pnand %p1873_p0, %p139_p1  ;;  %s155_s4 = sshll.u32 %s2493_s28, 4  ;;  %s2628_s4 = int_to_ptr.vmem [resolvable:$true] %s155_s4 }
  0x2e   : > { %s2966_s6 = scalar_select %p2620_p2, 1, 0 }
  0x2f   : > { %s2967_s7 = scalar_select %p2624_p3, 1, 0 }
  0x30   : > { %p2111_p4 = pneg %p2624_p3  ;;  %s1879_s12 = sshll.u32 %s171_s22, 9 }
  0x31   : > { %s2094_s8 = sshll.u32 %s2483_s16, 13  ;;  %s194_s20 = scalar_lea.vmem [#allocation7], %s1879_s12 }
  0x32   : > { %p2637_p5 = pnand %p2111_p4, %p2959_p13  ;;  %s2644_s19 = scalar_lea.hbm %s2957_s2, %s2094_s8 }
  0x33   : > { %s202_s21 = sshll.u32 %s194_s20, 4  ;;  %s2345_s22 = scalar_lea.hbm %s2955_s0, 512  ;;  %s2646_s21 = int_to_ptr.vmem [resolvable:$true] %s202_s21 }
  0x34   : > { %p2346_p7 = scmp.ne.s32.totalorder %s2955_s0, %s2345_s22  ;;  %p2347_p9 = pneg %p2637_p5 }
  0x35   : > { %p2352_p10 = scmp.lt.u32.totalorder %s2345_s22, %s2955_s0 }
  0x36   : > { %p2348_p11 = pnand %p2347_p9, %p2346_p7 }
  0x38   : > { %p2349_p12 = pneg %p2348_p11 }
  0x3a   : > { %p2354_p0 = pnand %p2352_p10, %p2349_p12 }
  0x3c   : > { %2357 = shalt.err (!%p2354_p0)
}
  0x3d   : > { %s2358_s12 = scalar_lea.vmem %s2628_s4, 512  ;;  %p2366_p8 = scmp.lt.s32.totalorder %s2628_s4, %s2628_s4 }
  0x3e   : > { %p2359_p1 = scmp.ne.s32.totalorder %s2628_s4, %s2358_s12  ;;  %p2367_p2 = scmp.lt.s32.totalorder %s2358_s12, %s2358_s12 }
  0x40   : > { %p2361_p4 = pnand %p2359_p1, %p2347_p9  ;;  %p2368_p3 = por %p2367_p2, %p2366_p8 }
  0x42   : > { %p2362_p13 = pneg %p2361_p4 }
  0x44   : > { %p2369_p6 = pnand %p2368_p3, %p2362_p13 }
  0x46   : > { %2372 = shalt.err (!%p2369_p6)
}
  0x47   : > { %s2494_s8 = smov 256   ;;  %s2495_s11 = smov 16  }
  0x48   : > { %2114 = dma.hbm_to_vmem [thread:$0]  (!%p2637_p5), %s2955_s0, 512, %s2628_s4, [#allocation3], %s2494_s8, %s2494_s8, %s2495_s11  }
  0x49   : > { %s2373_s25 = scalar_lea.hbm %s2644_s19, 8192  ;;  %p2969_p9 = scmp.ne.s32.totalorder %s2965_s29, 0 }
  0x4a   : > { %p2374_p7 = scmp.ne.s32.totalorder %s2644_s19, %s2373_s25  ;;  %s2378_s27 = scalar_lea.hbm %s2957_s2, 16384 }
  0x4b   : > { %p2970_p8 = pneg %p2969_p9  ;;  %p2379_p2 = scmp.lt.u32.totalorder %s2644_s19, %s2957_s2 }
  0x4c   : > { %p2380_p3 = scmp.lt.u32.totalorder %s2378_s27, %s2373_s25  ;;  %p2382_p12 = scmp.lt.u32.totalorder %s2373_s25, %s2644_s19 }
  0x4d   : > { %p2376_p13 = pnand %p2374_p7, %p2970_p8 }
  0x4e   : > { %p2381_p11 = por %p2380_p3, %p2379_p2 }
  0x4f   : > { %p2377_p6 = pneg %p2376_p13 }
  0x50   : > { %p2383_p10 = por %p2382_p12, %p2381_p11 }
  0x52   : > { %p2384_p0 = pnand %p2383_p10, %p2377_p6 }
  0x54   : > { %2387 = shalt.err (!%p2384_p0)
}
  0x55   : > { %s2388_s4 = scalar_lea.vmem %s2646_s21, 8192  ;;  %p2971_p1 = pmov %p2970_p8 }
  0x56   : > { %p2389_p5 = scmp.ne.s32.totalorder %s2646_s21, %s2388_s4  ;;  %s2496_s9 = smov [#allocation7]  }
  0x57   : > { %s2393_s12 = sshll.u32 %s2496_s9, 4  ;;  %s2394_s12 = int_to_ptr.vmem [resolvable:$false] %s2393_s12 }
  0x58   : > { %p2391_p4 = pnand %p2389_p5, %p2971_p1  ;;  %s2395_s8 = scalar_lea.vmem %s2394_s12, 16384 }
  0x59   : > { %p2396_p8 = scmp.lt.s32.totalorder %s2646_s21, %s2394_s12  ;;  %p2397_p13 = scmp.lt.s32.totalorder %s2395_s8, %s2388_s4 }
  0x5a   : > { %p2392_p7 = pneg %p2391_p4 }
  0x5b   : > { %p2398_p2 = por %p2397_p13, %p2396_p8 }
  0x5d   : > { %p2399_p3 = pnand %p2398_p2, %p2392_p7 }
  0x5f   : > { %2402 = shalt.err (!%p2399_p3)
}
  0x60   : > { %s2497_s11 = smov 128   ;;  %s2498_s20 = smov 8  }
  0x61   : > { %2121 = dma.hbm_to_vmem [thread:$0]  (!%p2969_p9), %s2644_s19, 8192, %s2646_s21, %s2582_s5, %s2497_s11, %s2497_s11, %s2498_s20  }
  0x62   : > { %p2972_p6 = scmp.ne.s32.totalorder %s2967_s7, 0 }
  0x63   : > { %p2973_p11 = scmp.eq.s32.totalorder (!%p2972_p6), %s2611_s30, 0 }
  0x64   : > { %214 = sbr.rel (%p2972_p6) target bundleno = 771 (0x303), region = 32 }
  0x6b   : > { %2454 = dma.done.wait (%p2973_p11), [#allocation3], 512   ;;  %p2974_p12 = pmov %p2973_p11 }
  0x6c   : > { %s220_s23 = sand.u32 1, %s2611_s30   ;;  %s222_s25 = sand.u32 1, %s2471_s13  }
  0x6d   : > { %2456 = vsyncadd (%p2974_p12), [#allocation3], 4294966784  ;;  %s1885_s22 = sshll.u32 %s222_s25, 10  ;;  %s221_s26 = scalar_lea.sflag [#allocation6], %s220_s23 }
  0x6e   : > { %s2701_s27 = scalar_lea.vmem [#allocation5], %s1885_s22  ;;  %p2975_p10 = scmp.ne.s32.totalorder %s2966_s6, 0 }
  0x70   : > { %2458 = dma.done.wait (%p2975_p10), %s221_s26, 24576  }
  0x71   : > { %2460 = vsyncadd (%p2975_p10), %s221_s26, 4294942720  ;;  %s1886_s29 = sshll.u32 %s222_s25, 9  ;;  %p1887_p9 = scmp.ne.s32.totalorder %s2479_s15, 0 }
  0x72   : > { %s2707_s5 = scalar_lea.vmem [#allocation7], %s1886_s29  ;;  %v2499_v0 = vmov (!%p1887_p9), 0.0  }
  0x73   : > { %263 = sbr.rel (%p1887_p9) target bundleno = 122 (0x7a), region = 48  ;;  %264 = vst [vmem:[#allocation8] sm:$0xff] (!%p1887_p9), %v2499_v0  ;;  %265 = vst [vmem:[#allocation8 + $0x8] sm:$0xff] (!%p1887_p9), %v2499_v0 }
  0x74   : > { %266 = vst [vmem:[#allocation8 + $0x10] sm:$0xff] (!%p1887_p9), %v2499_v0  ;;  %267 = vst [vmem:[#allocation8 + $0x18] sm:$0xff] (!%p1887_p9), %v2499_v0 }
  0x7a PF: > { %v274_v1 = vld [vmem:[%s2701_s27] sm:$0xff]  ;;  %v276_v12 = vld [vmem:[%s2701_s27 + $0x10] sm:$0xff]  ;;  %v269_v40 = vld [vmem:[#allocation2 + $0x8] sm:$0xff]  ;;  %s2500_s15 = smov [#allocation8]   ;;  %p2125_p0 = scmp.eq.s32.totalorder %s2611_s30, 1 }
  0x7b   : > { %v278_v2 = vld [vmem:[%s2701_s27 + $0x20] sm:$0xff]  ;;  %v280_v13 = vld [vmem:[%s2701_s27 + $0x30] sm:$0xff]  ;;  %v271_v43 = vld [vmem:[#allocation2 + $0x18] sm:$0xff]  ;;  %s1774_s6 = sshll.u32 %s2500_s15, 4  ;;  %s1775_s6 = int_to_ptr.vmem [resolvable:$true] %s1774_s6 }
  0x7c   : > { %v282_v3 = vld [vmem:[%s2701_s27 + $0x40] sm:$0xff]  ;;  %v1889_v4 = vcombine.high %v274_v1, %v278_v2  ;;  %v1888_v5 = vcombine.low %v274_v1, %v278_v2  ;;  %v1893_v16 = vcombine.high %v276_v12, %v280_v13  ;;  %v1892_v17 = vcombine.low %v276_v12, %v280_v13  ;;  %v284_v18 = vld [vmem:[%s2701_s27 + $0x50] sm:$0xff]  ;;  %s2403_s7 = scalar_lea.vmem %s1775_s6, 512  ;;  %p2410_p7 = scmp.lt.s32.totalorder %s1775_s6, %s1775_s6 }
  0x7d   : > { %v286_v6 = vld [vmem:[%s2701_s27 + $0x60] sm:$0xff]  ;;  %v288_v19 = vld [vmem:[%s2701_s27 + $0x70] sm:$0xff]  ;;  %v2734_v47 = vpack.c.bf16 %v271_v43, %v269_v40  ;;  %p2404_p5 = scmp.ne.s32.totalorder %s1775_s6, %s2403_s7  ;;  %p2411_p8 = scmp.lt.s32.totalorder %s2403_s7, %s2403_s7 }
  0x7e   : > { %v1897_v7 = vcombine.high %v282_v3, %v286_v6  ;;  %v290_v8 = vld [vmem:[%s2701_s27 + $0x80] sm:$0xff]  ;;  %1042 = vmatprep.subr.bf16.mxu1 %v1889_v4  ;;  %v1896_v10 = vcombine.low %v282_v3, %v286_v6  ;;  %1128 = vmatprep.subr.bf16.mxu0 %v1893_v16  ;;  %v1901_v21 = vcombine.high %v284_v18, %v288_v19  ;;  %v292_v22 = vld [vmem:[%s2701_s27 + $0x90] sm:$0xff] }
  0x7f   : > { %v294_v9 = vld [vmem:[%s2701_s27 + $0xa0] sm:$0xff]  ;;  %1043 = vmatpush1.bf16.msra.mxu1 %v1888_v5  ;;  %v296_v23 = vld [vmem:[%s2701_s27 + $0xb0] sm:$0xff]  ;;  %1129 = vmatpush1.bf16.msra.mxu0 %v1892_v17  ;;  %v1900_v25 = vcombine.low %v284_v18, %v288_v19  ;;  %p2405_p1 = pnand %p2404_p5, %p2125_p0  ;;  %p2412_p13 = por %p2411_p8, %p2410_p7 }
  0x80   : > { %1044 = vmatprep.subr.bf16.mxu1 %v1897_v7  ;;  %v1905_v11 = vcombine.high %v290_v8, %v294_v9  ;;  %v298_v14 = vld [vmem:[%s2701_s27 + $0xc0] sm:$0xff]  ;;  %v1904_v20 = vcombine.low %v290_v8, %v294_v9  ;;  %1130 = vmatprep.subr.bf16.mxu0 %v1901_v21  ;;  %v1909_v28 = vcombine.high %v292_v22, %v296_v23  ;;  %v300_v29 = vld [vmem:[%s2701_s27 + $0xd0] sm:$0xff] }
  0x81   : > { %v302_v15 = vld [vmem:[%s2701_s27 + $0xe0] sm:$0xff]  ;;  %v304_v30 = vld [vmem:[%s2701_s27 + $0xf0] sm:$0xff]  ;;  %v1908_v33 = vcombine.low %v292_v22, %v296_v23  ;;  %1074 = vmatprep.mubr.bf16.mxu1 %v2734_v47  ;;  %1160 = vmatprep.mubr.bf16.mxu0 %v2734_v47  ;;  %p2406_p4 = pneg %p2405_p1 }
  0x82   : > { %v1913_v24 = vcombine.high %v298_v14, %v302_v15  ;;  %v306_v26 = vld [vmem:[%s2701_s27 + $0x100] sm:$0xff]  ;;  %v1912_v31 = vcombine.low %v298_v14, %v302_v15  ;;  %v1917_v36 = vcombine.high %v300_v29, %v304_v30  ;;  %v308_v37 = vld [vmem:[%s2701_s27 + $0x110] sm:$0xff]  ;;  %v1916_v42 = vcombine.low %v300_v29, %v304_v30 }
  0x83   : > { %1045 = vmatpush1.bf16.msra.mxu1 %v1896_v10  ;;  %v310_v27 = vld [vmem:[%s2701_s27 + $0x120] sm:$0xff]  ;;  %1131 = vmatpush1.bf16.msra.mxu0 %v1900_v25  ;;  %v312_v38 = vld [vmem:[%s2701_s27 + $0x130] sm:$0xff]  ;;  %p2413_p2 = pnand %p2412_p13, %p2406_p4 }
  0x84   : > { %1046 = vmatprep.subr.bf16.mxu1 %v1905_v11  ;;  %v1921_v32 = vcombine.high %v306_v26, %v310_v27  ;;  %v314_v34 = vld [vmem:[%s2701_s27 + $0x140] sm:$0xff]  ;;  %1132 = vmatprep.subr.bf16.mxu0 %v1909_v28  ;;  %v1920_v39 = vcombine.low %v306_v26, %v310_v27  ;;  %v1925_v46 = vcombine.high %v308_v37, %v312_v38  ;;  %v316_v48 = vld [vmem:[%s2701_s27 + $0x150] sm:$0xff] }
  0x85   : > { %v318_v35 = vld [vmem:[%s2701_s27 + $0x160] sm:$0xff]  ;;  %v320_v49 = vld [vmem:[%s2701_s27 + $0x170] sm:$0xff]  ;;  %v1924_v52 = vcombine.low %v308_v37, %v312_v38 }
  0x86   : > { %v1929_v41 = vcombine.high %v314_v34, %v318_v35  ;;  %v322_v44 = vld [vmem:[%s2701_s27 + $0x180] sm:$0xff]  ;;  %v1928_v50 = vcombine.low %v314_v34, %v318_v35  ;;  %v1933_v55 = vcombine.high %v316_v48, %v320_v49  ;;  %v324_v56 = vld [vmem:[%s2701_s27 + $0x190] sm:$0xff]  ;;  %v1932_v60 = vcombine.low %v316_v48, %v320_v49 }
  0x87   : > { %1047 = vmatpush1.bf16.msra.mxu1 %v1904_v20  ;;  %1133 = vmatpush1.bf16.msra.mxu0 %v1908_v33  ;;  %v326_v45 = vld [vmem:[%s2701_s27 + $0x1a0] sm:$0xff]  ;;  %v328_v57 = vld [vmem:[%s2701_s27 + $0x1b0] sm:$0xff] }
  0x88   : > { %1048 = vmatprep.subr.bf16.mxu1 %v1913_v24  ;;  %1134 = vmatprep.subr.bf16.mxu0 %v1917_v36  ;;  %v1937_v51 = vcombine.high %v322_v44, %v326_v45  ;;  %v330_v53 = vld [vmem:[%s2701_s27 + $0x1c0] sm:$0xff]  ;;  %v1936_v58 = vcombine.low %v322_v44, %v326_v45  ;;  %v1941_v63 = vcombine.high %v324_v56, %v328_v57  ;;  %v332_v0 = vld [vmem:[%s2701_s27 + $0x1d0] sm:$0xff] }
  0x89   : > { %v334_v54 = vld [vmem:[%s2701_s27 + $0x1e0] sm:$0xff]  ;;  %v336_v1 = vld [vmem:[%s2701_s27 + $0x1f0] sm:$0xff]  ;;  %v1940_v4 = vcombine.low %v324_v56, %v328_v57 }
  0x8a   : > { %v1945_v59 = vcombine.high %v330_v53, %v334_v54  ;;  %v338_v61 = vld [vmem:[%s2701_s27 + $0x200] sm:$0xff]  ;;  %v1944_v2 = vcombine.low %v330_v53, %v334_v54  ;;  %v1949_v7 = vcombine.high %v332_v0, %v336_v1  ;;  %v340_v8 = vld [vmem:[%s2701_s27 + $0x210] sm:$0xff]  ;;  %v1948_v12 = vcombine.low %v332_v0, %v336_v1 }
  0x8b   : > { %1049 = vmatpush1.bf16.msra.mxu1 %v1912_v31  ;;  %1135 = vmatpush1.bf16.msra.mxu0 %v1916_v42  ;;  %v342_v62 = vld [vmem:[%s2701_s27 + $0x220] sm:$0xff]  ;;  %v344_v9 = vld [vmem:[%s2701_s27 + $0x230] sm:$0xff] }
  0x8c   : > { %1050 = vmatprep.subr.bf16.mxu1 %v1921_v32  ;;  %1136 = vmatprep.subr.bf16.mxu0 %v1925_v46  ;;  %v1953_v3 = vcombine.high %v338_v61, %v342_v62  ;;  %v346_v5 = vld [vmem:[%s2701_s27 + $0x240] sm:$0xff]  ;;  %v1952_v10 = vcombine.low %v338_v61, %v342_v62  ;;  %v1957_v15 = vcombine.high %v340_v8, %v344_v9  ;;  %v348_v16 = vld [vmem:[%s2701_s27 + $0x250] sm:$0xff]  ;;  %v279_v61 = vld [vmem:[%s2701_s27 + $0x28] sm:$0xff] }
  0x8d   : > { %v350_v6 = vld [vmem:[%s2701_s27 + $0x260] sm:$0xff]  ;;  %v352_v17 = vld [vmem:[%s2701_s27 + $0x270] sm:$0xff]  ;;  %v1956_v20 = vcombine.low %v340_v8, %v344_v9 }
  0x8e   : > { %v1961_v11 = vcombine.high %v346_v5, %v350_v6  ;;  %v354_v13 = vld [vmem:[%s2701_s27 + $0x280] sm:$0xff]  ;;  %v1960_v18 = vcombine.low %v346_v5, %v350_v6  ;;  %v1965_v23 = vcombine.high %v348_v16, %v352_v17  ;;  %v356_v24 = vld [vmem:[%s2701_s27 + $0x290] sm:$0xff]  ;;  %v1964_v30 = vcombine.low %v348_v16, %v352_v17  ;;  %v283_v6 = vld [vmem:[%s2701_s27 + $0x48] sm:$0xff] }
  0x8f   : > { %1051 = vmatpush1.bf16.msra.mxu1 %v1920_v39  ;;  %1137 = vmatpush1.bf16.msra.mxu0 %v1924_v52  ;;  %v358_v14 = vld [vmem:[%s2701_s27 + $0x2a0] sm:$0xff]  ;;  %v360_v25 = vld [vmem:[%s2701_s27 + $0x2b0] sm:$0xff]  ;;  %v295_v16 = vld [vmem:[%s2701_s27 + $0xa8] sm:$0xff] }
  0x90   : > { %1052 = vmatprep.subr.bf16.mxu1 %v1929_v41  ;;  %1138 = vmatprep.subr.bf16.mxu0 %v1933_v55  ;;  %v1969_v19 = vcombine.high %v354_v13, %v358_v14  ;;  %v362_v21 = vld [vmem:[%s2701_s27 + $0x2c0] sm:$0xff]  ;;  %v1968_v26 = vcombine.low %v354_v13, %v358_v14  ;;  %v364_v31 = vld [vmem:[%s2701_s27 + $0x2d0] sm:$0xff]  ;;  %v1973_v33 = vcombine.high %v356_v24, %v360_v25 }
  0x91   : > { %v366_v22 = vld [vmem:[%s2701_s27 + $0x2e0] sm:$0xff]  ;;  %v368_v32 = vld [vmem:[%s2701_s27 + $0x2f0] sm:$0xff]  ;;  %v1972_v38 = vcombine.low %v356_v24, %v360_v25 }
  0x92   : > { %v370_v27 = vld [vmem:[%s2701_s27 + $0x300] sm:$0xff]  ;;  %v1977_v29 = vcombine.high %v362_v21, %v366_v22  ;;  %v1976_v34 = vcombine.low %v362_v21, %v366_v22  ;;  %v372_v39 = vld [vmem:[%s2701_s27 + $0x310] sm:$0xff]  ;;  %v1981_v41 = vcombine.high %v364_v31, %v368_v32  ;;  %v1980_v46 = vcombine.low %v364_v31, %v368_v32  ;;  %v299_v21 = vld [vmem:[%s2701_s27 + $0xc8] sm:$0xff] }
  0x93   : > { %1053 = vmatpush1.bf16.msra.mxu1 %v1928_v50  ;;  %1139 = vmatpush1.bf16.msra.mxu0 %v1932_v60  ;;  %v374_v28 = vld [vmem:[%s2701_s27 + $0x320] sm:$0xff]  ;;  %v376_v40 = vld [vmem:[%s2701_s27 + $0x330] sm:$0xff]  ;;  %v275_v60 = vld [vmem:[%s2701_s27 + $0x8] sm:$0xff] }
  0x94   : > { %1054 = vmatprep.subr.bf16.mxu1 %v1937_v51  ;;  %1140 = vmatprep.subr.bf16.mxu0 %v1941_v63  ;;  %v378_v35 = vld [vmem:[%s2701_s27 + $0x340] sm:$0xff]  ;;  %v1985_v37 = vcombine.high %v370_v27, %v374_v28  ;;  %v1984_v42 = vcombine.low %v370_v27, %v374_v28  ;;  %v380_v48 = vld [vmem:[%s2701_s27 + $0x350] sm:$0xff]  ;;  %v1989_v50 = vcombine.high %v372_v39, %v376_v40  ;;  %v303_v22 = vld [vmem:[%s2701_s27 + $0xe8] sm:$0xff] }
  0x95   : > { %v382_v36 = vld [vmem:[%s2701_s27 + $0x360] sm:$0xff]  ;;  %v384_v49 = vld [vmem:[%s2701_s27 + $0x370] sm:$0xff]  ;;  %v1988_v55 = vcombine.low %v372_v39, %v376_v40  ;;  %v1891_v8 = vcombine.high %v275_v60, %v279_v61  ;;  %v1915_v25 = vcombine.high %v299_v21, %v303_v22  ;;  %v307_v27 = vld [vmem:[%s2701_s27 + $0x108] sm:$0xff] }
  0x96   : > { %v386_v43 = vld [vmem:[%s2701_s27 + $0x380] sm:$0xff]  ;;  %v1993_v45 = vcombine.high %v378_v35, %v382_v36  ;;  %v1992_v51 = vcombine.low %v378_v35, %v382_v36  ;;  %v388_v56 = vld [vmem:[%s2701_s27 + $0x390] sm:$0xff]  ;;  %v1996_v63 = vcombine.low %v380_v48, %v384_v49  ;;  %v311_v28 = vld [vmem:[%s2701_s27 + $0x128] sm:$0xff] }
  0x97   : > { %1055 = vmatpush1.bf16.msra.mxu1 %v1936_v58  ;;  %1141 = vmatpush1.bf16.msra.mxu0 %v1940_v4  ;;  %v390_v44 = vld [vmem:[%s2701_s27 + $0x3a0] sm:$0xff]  ;;  %v392_v57 = vld [vmem:[%s2701_s27 + $0x3b0] sm:$0xff]  ;;  %v1997_v58 = vcombine.high %v380_v48, %v384_v49  ;;  %v1923_v31 = vcombine.high %v307_v27, %v311_v28  ;;  %v1922_v36 = vcombine.low %v307_v27, %v311_v28  ;;  %v323_v39 = vld [vmem:[%s2701_s27 + $0x188] sm:$0xff] }
  0x98   : > { %1056 = vmatprep.subr.bf16.mxu1 %v1945_v59  ;;  %1142 = vmatprep.subr.bf16.mxu0 %v1949_v7  ;;  %v394_v52 = vld [vmem:[%s2701_s27 + $0x3c0] sm:$0xff]  ;;  %v2001_v54 = vcombine.high %v386_v43, %v390_v44  ;;  %v2000_v59 = vcombine.low %v386_v43, %v390_v44  ;;  %v396_v0 = vld [vmem:[%s2701_s27 + $0x3d0] sm:$0xff]  ;;  %v2005_v4 = vcombine.high %v388_v56, %v392_v57  ;;  %v287_v7 = vld [vmem:[%s2701_s27 + $0x68] sm:$0xff] }
  0x99   : > { %v398_v53 = vld [vmem:[%s2701_s27 + $0x3e0] sm:$0xff]  ;;  %v400_v1 = vld [vmem:[%s2701_s27 + $0x3f0] sm:$0xff]  ;;  %v2004_v9 = vcombine.low %v388_v56, %v392_v57  ;;  %v1899_v13 = vcombine.high %v283_v6, %v287_v7  ;;  %v327_v40 = vld [vmem:[%s2701_s27 + $0x1a8] sm:$0xff] }
  0x9a   : > { %v2009_v62 = vcombine.high %v394_v52, %v398_v53  ;;  %v2008_v5 = vcombine.low %v394_v52, %v398_v53  ;;  %v2012_v14 = vcombine.low %v396_v0, %v400_v1  ;;  %v2189_v17 = vld [vmem:[%s2707_s5 + $0x4] ss:$8 sps:$4 sm:$0xff]   ;;  %v2193_v32 = vld [vmem:[%s2707_s5 + $0x20] ss:$8 sps:$4 sm:$0xff]   ;;  %v2198_v35 = vld [vmem:[%s2707_s5 + $0x34] ss:$8 sps:$4 sm:$0xff]   ;;  %v1939_v43 = vcombine.high %v323_v39, %v327_v40 }
  0x9b   : > { %1057 = vmatpush1.bf16.msra.mxu1 %v1944_v2  ;;  %1143 = vmatpush1.bf16.msra.mxu0 %v1948_v12  ;;  %v268_v2 = vld [vmem:[#allocation2] sm:$0xff]  ;;  %v1890_v12 = vcombine.low %v275_v60, %v279_v61  ;;  %v2204_v48 = vld [vmem:[%s2707_s5 + $0x54] ss:$8 sps:$4 sm:$0xff]   ;;  %v1938_v49 = vcombine.low %v323_v39, %v327_v40  ;;  %v339_v52 = vld [vmem:[%s2701_s27 + $0x208] sm:$0xff] }
  0x9c   : > { %1058 = vmatprep.subr.bf16.mxu1 %v1953_v3  ;;  %1144 = vmatprep.subr.bf16.mxu0 %v1957_v15  ;;  %v270_v3 = vld [vmem:[#allocation2 + $0x10] sm:$0xff]  ;;  %v291_v15 = vld [vmem:[%s2701_s27 + $0x88] sm:$0xff]  ;;  %v285_v27 = vld [vmem:[%s2701_s27 + $0x58] sm:$0xff] }
  0x9d   : > { %v1906_v24 = vcombine.low %v291_v15, %v295_v16  ;;  %v2199_v44 = vld [vmem:[%s2707_s5 + $0x40] ss:$8 sps:$4 sm:$0xff]   ;;  %v289_v28 = vld [vmem:[%s2701_s27 + $0x78] sm:$0xff] }
  0x9e   : > { %v343_v53 = vld [vmem:[%s2701_s27 + $0x228] sm:$0xff]  ;;  %v309_v39 = vld [vmem:[%s2701_s27 + $0x118] sm:$0xff] }
  0x9f   : > { %1059 = vmatpush1.bf16.msra.mxu1 %v1952_v10  ;;  %1145 = vmatpush1.bf16.msra.mxu0 %v1956_v20  ;;  %v2013_v10 = vcombine.high %v396_v0, %v400_v1  ;;  %v2187_v20 = vld [vmem:[%s2707_s5] ss:$8 sps:$4 sm:$0xff]   ;;  %v1955_v56 = vcombine.high %v339_v52, %v343_v53  ;;  %v1954_v60 = vcombine.low %v339_v52, %v343_v53  ;;  %v313_v40 = vld [vmem:[%s2701_s27 + $0x138] sm:$0xff] }
  0xa0   : > { %1060 = vmatprep.subr.bf16.mxu1 %v1961_v11  ;;  %1146 = vmatprep.subr.bf16.mxu0 %v1965_v23  ;;  %v2782_v11 = vpack.c.bf16 %v270_v3, %v268_v2  ;;  %v2192_v23 = vld [vmem:[%s2707_s5 + $0x14] ss:$8 sps:$4 sm:$0xff]   ;;  %v2205_v57 = vld [vmem:[%s2707_s5 + $0x60] ss:$8 sps:$4 sm:$0xff]  }
  0xa1   : > { %v363_v2 = vld [vmem:[%s2701_s27 + $0x2c8] sm:$0xff]  ;;  %v333_v52 = vld [vmem:[%s2701_s27 + $0x1d8] sm:$0xff] }
  0xa2   : > { %v367_v3 = vld [vmem:[%s2701_s27 + $0x2e8] sm:$0xff]  ;;  %v337_v53 = vld [vmem:[%s2701_s27 + $0x1f8] sm:$0xff] }
  0xa3   : > { %1061 = vmatpush1.bf16.msra.mxu1 %v1960_v18  ;;  %1147 = vmatpush1.bf16.msra.mxu0 %v1964_v30  ;;  %v1898_v18 = vcombine.low %v283_v6, %v287_v7  ;;  %v1914_v30 = vcombine.low %v299_v21, %v303_v22  ;;  %v371_v6 = vld [vmem:[%s2701_s27 + $0x308] sm:$0xff] }
  0xa4   : > { %1062 = vmatprep.subr.bf16.mxu1 %v1969_v19  ;;  %1148 = vmatprep.subr.bf16.mxu0 %v1973_v33  ;;  %v1907_v19 = vcombine.high %v291_v15, %v295_v16  ;;  %v315_v33 = vld [vmem:[%s2701_s27 + $0x148] sm:$0xff] }
  0xa5   : > { %v375_v7 = vld [vmem:[%s2701_s27 + $0x328] sm:$0xff] }
  0xa6   : > { %v387_v15 = vld [vmem:[%s2701_s27 + $0x388] sm:$0xff] }
  0xa7   : > { %1063 = vmatpush1.bf16.msra.mxu1 %v1968_v26  ;;  %1149 = vmatpush1.bf16.msra.mxu0 %v1972_v38  ;;  %v2190_v26 = vld [vmem:[%s2707_s5 + $0x10] ss:$8 sps:$4 sm:$0xff]   ;;  %v391_v16 = vld [vmem:[%s2701_s27 + $0x3a8] sm:$0xff] }
  0xa8   : > { %1064 = vmatprep.subr.bf16.mxu1 %v1977_v29  ;;  %1150 = vmatprep.subr.bf16.mxu0 %v1981_v41  ;;  %v2195_v29 = vld [vmem:[%s2707_s5 + $0x24] ss:$8 sps:$4 sm:$0xff]   ;;  %v2196_v38 = vld [vmem:[%s2707_s5 + $0x30] ss:$8 sps:$4 sm:$0xff]   ;;  %v2002_v21 = vcombine.low %v387_v15, %v391_v16 }
  0xa9   : > { %v2201_v41 = vld [vmem:[%s2707_s5 + $0x44] ss:$8 sps:$4 sm:$0xff]  }
  0xab   : > { %1065 = vmatpush1.bf16.msra.mxu1 %v1976_v34  ;;  %1151 = vmatpush1.bf16.msra.mxu0 %v1980_v46  ;;  %v319_v34 = vld [vmem:[%s2701_s27 + $0x168] sm:$0xff] }
  0xac   : > { %1066 = vmatprep.subr.bf16.mxu1 %v1985_v37  ;;  %1152 = vmatprep.subr.bf16.mxu0 %v1989_v50  ;;  %v1931_v37 = vcombine.high %v315_v33, %v319_v34  ;;  %v335_v46 = vld [vmem:[%s2701_s27 + $0x1e8] sm:$0xff] }
  0xaf   : > { %1067 = vmatpush1.bf16.msra.mxu1 %v1984_v42  ;;  %1153 = vmatpush1.bf16.msra.mxu0 %v1988_v55  ;;  %v1930_v42 = vcombine.low %v315_v33, %v319_v34  ;;  %v1902_v33 = vcombine.low %v285_v27, %v289_v28 }
  0xb0   : > { %1068 = vmatprep.subr.bf16.mxu1 %v1993_v45  ;;  %1154 = vmatprep.subr.bf16.mxu0 %v1997_v58  ;;  %v331_v45 = vld [vmem:[%s2701_s27 + $0x1c8] sm:$0xff] }
  0xb1   : > { %v1947_v50 = vcombine.high %v331_v45, %v335_v46  ;;  %v1946_v55 = vcombine.low %v331_v45, %v335_v46  ;;  %v347_v58 = vld [vmem:[%s2701_s27 + $0x248] sm:$0xff]  ;;  %v325_v46 = vld [vmem:[%s2701_s27 + $0x198] sm:$0xff] }
  0xb3   : > { %1069 = vmatpush1.bf16.msra.mxu1 %v1992_v51  ;;  %1155 = vmatpush1.bf16.msra.mxu0 %v1996_v63  ;;  %v2202_v51 = vld [vmem:[%s2707_s5 + $0x50] ss:$8 sps:$4 sm:$0xff]   ;;  %v359_v63 = vld [vmem:[%s2701_s27 + $0x2a8] sm:$0xff] }
  0xb4   : > { %1070 = vmatprep.subr.bf16.mxu1 %v2001_v54  ;;  %1156 = vmatprep.subr.bf16.mxu0 %v2005_v4  ;;  %v2207_v54 = vld [vmem:[%s2707_s5 + $0x64] ss:$8 sps:$4 sm:$0xff]  }
  0xb7   : > { %1071 = vmatpush1.bf16.msra.mxu1 %v2000_v59  ;;  %1157 = vmatpush1.bf16.msra.mxu0 %v2004_v9  ;;  %v351_v59 = vld [vmem:[%s2701_s27 + $0x268] sm:$0xff]  ;;  %v1987_v9 = vcombine.high %v371_v6, %v375_v7 }
  0xb8   : > { %1072 = vmatprep.subr.bf16.mxu1 %v2009_v62  ;;  %1158 = vmatprep.subr.bf16.mxu0 %v2013_v10  ;;  %v1963_v61 = vcombine.high %v347_v58, %v351_v59  ;;  %v355_v62 = vld [vmem:[%s2701_s27 + $0x288] sm:$0xff]  ;;  %v1962_v0 = vcombine.low %v347_v58, %v351_v59  ;;  %v341_v58 = vld [vmem:[%s2701_s27 + $0x218] sm:$0xff] }
  0xb9   : > { %v1971_v1 = vcombine.high %v355_v62, %v359_v63  ;;  %v1970_v4 = vcombine.low %v355_v62, %v359_v63  ;;  %v379_v10 = vld [vmem:[%s2701_s27 + $0x348] sm:$0xff]  ;;  %v345_v59 = vld [vmem:[%s2701_s27 + $0x238] sm:$0xff] }
  0xba   : > { %v1959_v62 = vcombine.high %v341_v58, %v345_v59  ;;  %v2216_v63 = vld [vmem:[%s2707_s5 + $0x94] ss:$8 sps:$4 sm:$0xff]  }
  0xbb   : > { %1073 = vmatpush1.bf16.msra.mxu1 %v2008_v5  ;;  %1159 = vmatpush1.bf16.msra.mxu0 %v2012_v14  ;;  %v1979_v5 = vcombine.high %v363_v2, %v367_v3 }
  0xbc   : > { %1085 = vmatprep.subr.bf16.mxu1 %v1891_v8  ;;  %1670 = vmatprep.subr.bf16.mxu0 %v2189_v17  ;;  %v1978_v8 = vcombine.low %v363_v2, %v367_v3  ;;  %v2214_v2 = vld [vmem:[%s2707_s5 + $0x90] ss:$8 sps:$4 sm:$0xff]   ;;  %v1958_v3 = vcombine.low %v341_v58, %v345_v59 }
  0xbe   : > { %1075 = vmatmul.mubr.bf16.vlgmr.msra.gmra.mrb[0].mxu1 %v2782_v11  ;;  %1161 = vmatmul.mubr.bf16.vlgmr.msra.gmra.mrb[0].mxu0 %v2782_v11 }
  0xbf   : > { %1086 = vmatpush1.bf16.msra.mxu1 %v1890_v12  ;;  %1117 = vmatprep.mubr.bf16.mxu1 %v2734_v47  ;;  %v383_v12 = vld [vmem:[%s2701_s27 + $0x368] sm:$0xff] }
  0xc0   : > { %1087 = vmatprep.subr.bf16.mxu1 %v1899_v13  ;;  %1671 = vmatpush1.bf16.msra.mxu0 %v2187_v20  ;;  %v1986_v13 = vcombine.low %v371_v6, %v375_v7  ;;  %v1995_v14 = vcombine.high %v379_v10, %v383_v12  ;;  %v1994_v17 = vcombine.low %v379_v10, %v383_v12  ;;  %v399_v20 = vld [vmem:[%s2701_s27 + $0x3e8] sm:$0xff]  ;;  %v357_v6 = vld [vmem:[%s2701_s27 + $0x298] sm:$0xff] }
  0xc1   : > { %1672 = vmatprep.subr.bf16.mxu0 %v2192_v23  ;;  %v277_v23 = vld [vmem:[%s2701_s27 + $0x18] sm:$0xff] }
  0xc2   : > { %v361_v7 = vld [vmem:[%s2701_s27 + $0x2b8] sm:$0xff] }
  0xc3   : > { %1088 = vmatpush1.bf16.msra.mxu1 %v1898_v18  ;;  %v2003_v18 = vcombine.high %v387_v15, %v391_v16  ;;  %v1975_v10 = vcombine.high %v357_v6, %v361_v7  ;;  %v2222_v12 = vld [vmem:[%s2707_s5 + $0xb4] ss:$8 sps:$4 sm:$0xff]   ;;  %v2220_v15 = vld [vmem:[%s2707_s5 + $0xb0] ss:$8 sps:$4 sm:$0xff]   ;;  %v1974_v16 = vcombine.low %v357_v6, %v361_v7 }
  0xc4   : > { %1089 = vmatprep.subr.bf16.mxu1 %v1907_v19  ;;  %1673 = vmatpush1.bf16.msra.mxu0 %v2190_v26  ;;  %v395_v19 = vld [vmem:[%s2701_s27 + $0x3c8] sm:$0xff] }
  0xc5   : > { %1674 = vmatprep.subr.bf16.mxu0 %v2195_v29  ;;  %v2011_v22 = vcombine.high %v395_v19, %v399_v20 }
  0xc7   : > { %1090 = vmatpush1.bf16.msra.mxu1 %v1906_v24  ;;  %v281_v24 = vld [vmem:[%s2701_s27 + $0x38] sm:$0xff] }
  0xc8   : > { %1091 = vmatprep.subr.bf16.mxu1 %v1915_v25  ;;  %1675 = vmatpush1.bf16.msra.mxu0 %v2193_v32  ;;  %v2010_v25 = vcombine.low %v395_v19, %v399_v20  ;;  %v1895_v26 = vcombine.high %v277_v23, %v281_v24  ;;  %v1894_v29 = vcombine.low %v277_v23, %v281_v24  ;;  %v297_v32 = vld [vmem:[%s2701_s27 + $0xb8] sm:$0xff] }
  0xc9   : > { %1676 = vmatprep.subr.bf16.mxu0 %v2198_v35  ;;  %v301_v35 = vld [vmem:[%s2701_s27 + $0xd8] sm:$0xff] }
  0xca   : > { %v373_v19 = vld [vmem:[%s2701_s27 + $0x318] sm:$0xff] }
  0xcb   : > { %1092 = vmatpush1.bf16.msra.mxu1 %v1914_v30  ;;  %v1903_v30 = vcombine.high %v285_v27, %v289_v28  ;;  %v377_v20 = vld [vmem:[%s2701_s27 + $0x338] sm:$0xff] }
  0xcc   : > { %1093 = vmatprep.subr.bf16.mxu1 %v1923_v31  ;;  %1677 = vmatpush1.bf16.msra.mxu0 %v2196_v38  ;;  %v293_v31 = vld [vmem:[%s2701_s27 + $0x98] sm:$0xff]  ;;  %v1991_v23 = vcombine.high %v373_v19, %v377_v20  ;;  %v1990_v28 = vcombine.low %v373_v19, %v377_v20 }
  0xcd   : > { %1678 = vmatprep.subr.bf16.mxu0 %v2201_v41  ;;  %v1911_v34 = vcombine.high %v293_v31, %v297_v32  ;;  %v2228_v24 = vld [vmem:[%s2707_s5 + $0xd4] ss:$8 sps:$4 sm:$0xff]   ;;  %v2226_v27 = vld [vmem:[%s2707_s5 + $0xd0] ss:$8 sps:$4 sm:$0xff]  }
  0xce   : > { %v2246_v19 = vld [vmem:[%s2707_s5 + $0x134] ss:$8 sps:$4 sm:$0xff]   ;;  %v2244_v20 = vld [vmem:[%s2707_s5 + $0x130] ss:$8 sps:$4 sm:$0xff]  }
  0xcf   : > { %1094 = vmatpush1.bf16.msra.mxu1 %v1922_v36  ;;  %v305_v36 = vld [vmem:[%s2701_s27 + $0xf8] sm:$0xff] }
  0xd0   : > { %1095 = vmatprep.subr.bf16.mxu1 %v1931_v37  ;;  %1679 = vmatpush1.bf16.msra.mxu0 %v2199_v44  ;;  %v1910_v37 = vcombine.low %v293_v31, %v297_v32  ;;  %v1919_v38 = vcombine.high %v301_v35, %v305_v36  ;;  %v1918_v41 = vcombine.low %v301_v35, %v305_v36  ;;  %v389_v31 = vld [vmem:[%s2701_s27 + $0x398] sm:$0xff] }
  0xd1   : > { %1680 = vmatprep.subr.bf16.mxu0 %v2204_v48  ;;  %v1926_v44 = vcombine.low %v309_v39, %v313_v40  ;;  %v329_v48 = vld [vmem:[%s2701_s27 + $0x1b8] sm:$0xff] }
  0xd2   : > { %v393_v32 = vld [vmem:[%s2701_s27 + $0x3b8] sm:$0xff] }
  0xd3   : > { %1096 = vmatpush1.bf16.msra.mxu1 %v1930_v42  ;;  %v317_v42 = vld [vmem:[%s2701_s27 + $0x158] sm:$0xff]  ;;  %v2007_v35 = vcombine.high %v389_v31, %v393_v32 }
  0xd4   : > { %1097 = vmatprep.subr.bf16.mxu1 %v1939_v43  ;;  %1681 = vmatpush1.bf16.msra.mxu0 %v2202_v51  ;;  %v321_v43 = vld [vmem:[%s2701_s27 + $0x178] sm:$0xff] }
  0xd5   : > { %1682 = vmatprep.subr.bf16.mxu0 %v2207_v54  ;;  %v1935_v45 = vcombine.high %v317_v42, %v321_v43  ;;  %v2210_v51 = vld [vmem:[%s2707_s5 + $0x74] ss:$8 sps:$4 sm:$0xff]   ;;  %v2208_v54 = vld [vmem:[%s2707_s5 + $0x70] ss:$8 sps:$4 sm:$0xff]  }
  0xd6   : > { %v2234_v36 = vld [vmem:[%s2707_s5 + $0xf4] ss:$8 sps:$4 sm:$0xff]  }
  0xd7   : > { %1098 = vmatpush1.bf16.msra.mxu1 %v1938_v49  ;;  %v1934_v49 = vcombine.low %v317_v42, %v321_v43  ;;  %v2237_v42 = vld [vmem:[%s2707_s5 + $0x104] ss:$8 sps:$4 sm:$0xff]  }
  0xd8   : > { %1099 = vmatprep.subr.bf16.mxu1 %v1947_v50  ;;  %1683 = vmatpush1.bf16.msra.mxu0 %v2205_v57  ;;  %v1943_v50 = vcombine.high %v325_v46, %v329_v48  ;;  %v2213_v57 = vld [vmem:[%s2707_s5 + $0x84] ss:$8 sps:$4 sm:$0xff]  }
  0xd9   : > { %1684 = vmatprep.subr.bf16.mxu0 %v2210_v51 }
  0xdb   : > { %1100 = vmatpush1.bf16.msra.mxu1 %v1946_v55  ;;  %v1942_v55 = vcombine.low %v325_v46, %v329_v48 }
  0xdc   : > { %1101 = vmatprep.subr.bf16.mxu1 %v1955_v56  ;;  %1685 = vmatpush1.bf16.msra.mxu0 %v2208_v54  ;;  %v1951_v56 = vcombine.high %v333_v52, %v337_v53 }
  0xdd   : > { %1686 = vmatprep.subr.bf16.mxu0 %v2213_v57 }
  0xdf   : > { %1102 = vmatpush1.bf16.msra.mxu1 %v1954_v60  ;;  %v2211_v60 = vld [vmem:[%s2707_s5 + $0x80] ss:$8 sps:$4 sm:$0xff]  }
  0xe0   : > { %1103 = vmatprep.subr.bf16.mxu1 %v1963_v61  ;;  %v1950_v61 = vcombine.low %v333_v52, %v337_v53  ;;  %1687 = vmatpush1.bf16.msra.mxu0 %v2211_v60 }
  0xe1   : > { %1688 = vmatprep.subr.bf16.mxu0 %v2216_v63 }
  0xe3   : > { %1104 = vmatpush1.bf16.msra.mxu1 %v1962_v0  ;;  %v349_v0 = vld [vmem:[%s2701_s27 + $0x258] sm:$0xff] }
  0xe4   : > { %1105 = vmatprep.subr.bf16.mxu1 %v1971_v1  ;;  %v353_v1 = vld [vmem:[%s2701_s27 + $0x278] sm:$0xff]  ;;  %1689 = vmatpush1.bf16.msra.mxu0 %v2214_v2 }
  0xe7   : > { %1106 = vmatpush1.bf16.msra.mxu1 %v1970_v4  ;;  %v1967_v4 = vcombine.high %v349_v0, %v353_v1 }
  0xe8   : > { %1107 = vmatprep.subr.bf16.mxu1 %v1979_v5  ;;  %v2219_v5 = vld [vmem:[%s2707_s5 + $0xa4] ss:$8 sps:$4 sm:$0xff]  }
  0xe9   : > { %1690 = vmatprep.subr.bf16.mxu0 %v2219_v5 }
  0xeb   : > { %1108 = vmatpush1.bf16.msra.mxu1 %v1978_v8  ;;  %v2217_v8 = vld [vmem:[%s2707_s5 + $0xa0] ss:$8 sps:$4 sm:$0xff]  }
  0xec   : > { %1109 = vmatprep.subr.bf16.mxu1 %v1987_v9  ;;  %v1966_v9 = vcombine.low %v349_v0, %v353_v1  ;;  %1691 = vmatpush1.bf16.msra.mxu0 %v2217_v8 }
  0xed   : > { %1692 = vmatprep.subr.bf16.mxu0 %v2222_v12 }
  0xef   : > { %1110 = vmatpush1.bf16.msra.mxu1 %v1986_v13  ;;  %v365_v13 = vld [vmem:[%s2701_s27 + $0x2d8] sm:$0xff] }
  0xf0   : > { %1111 = vmatprep.subr.bf16.mxu1 %v1995_v14  ;;  %v369_v14 = vld [vmem:[%s2701_s27 + $0x2f8] sm:$0xff]  ;;  %1693 = vmatpush1.bf16.msra.mxu0 %v2220_v15 }
  0xf1   : > { %v2240_v15 = vld [vmem:[%s2707_s5 + $0x114] ss:$8 sps:$4 sm:$0xff]  }
  0xf3   : > { %1112 = vmatpush1.bf16.msra.mxu1 %v1994_v17  ;;  %v1983_v17 = vcombine.high %v365_v13, %v369_v14 }
  0xf4   : > { %1113 = vmatprep.subr.bf16.mxu1 %v2003_v18  ;;  %v2225_v18 = vld [vmem:[%s2707_s5 + $0xc4] ss:$8 sps:$4 sm:$0xff]  }
  0xf5   : > { %1694 = vmatprep.subr.bf16.mxu0 %v2225_v18  ;;  %v2241_v18 = vld [vmem:[%s2707_s5 + $0x120] ss:$8 sps:$4 sm:$0xff]  }
  0xf7   : > { %1114 = vmatpush1.bf16.msra.mxu1 %v2002_v21  ;;  %v2223_v21 = vld [vmem:[%s2707_s5 + $0xc0] ss:$8 sps:$4 sm:$0xff]  }
  0xf8   : > { %1115 = vmatprep.subr.bf16.mxu1 %v2011_v22  ;;  %v1982_v22 = vcombine.low %v365_v13, %v369_v14  ;;  %1695 = vmatpush1.bf16.msra.mxu0 %v2223_v21  ;;  %v2235_v14 = vld [vmem:[%s2707_s5 + $0x100] ss:$8 sps:$4 sm:$0xff]   ;;  %v2249_v21 = vld [vmem:[%s2707_s5 + $0x144] ss:$8 sps:$4 sm:$0xff]  }
  0xf9   : > { %1696 = vmatprep.subr.bf16.mxu0 %v2228_v24  ;;  %v2250_v24 = vld [vmem:[%s2707_s5 + $0x150] ss:$8 sps:$4 sm:$0xff]  }
  0xfb   : > { %1116 = vmatpush1.bf16.msra.mxu1 %v2010_v25  ;;  %v381_v25 = vld [vmem:[%s2701_s27 + $0x358] sm:$0xff] }
  0xfc   : > { %1171 = vmatprep.subr.bf16.mxu1 %v1895_v26  ;;  %v385_v26 = vld [vmem:[%s2701_s27 + $0x378] sm:$0xff]  ;;  %1697 = vmatpush1.bf16.msra.mxu0 %v2226_v27 }
  0xfd   : > { %v2258_v27 = vld [vmem:[%s2707_s5 + $0x174] ss:$8 sps:$4 sm:$0xff]  }
  0xfe   : > { %1118 = vmatmul.mubr.bf16.vlgmr.msra.gmra.mrb[4].mxu1 %v2782_v11 }
  0xff   : > { %1172 = vmatpush1.bf16.msra.mxu1 %v1894_v29  ;;  %1203 = vmatprep.mubr.bf16.mxu1 %v2734_v47  ;;  %v1927_v47 = vcombine.high %v309_v39, %v313_v40  ;;  %v1999_v29 = vcombine.high %v381_v25, %v385_v26  ;;  %v2232_v39 = vld [vmem:[%s2707_s5 + $0xf0] ss:$8 sps:$4 sm:$0xff]   ;;  %v2006_v40 = vcombine.low %v389_v31, %v393_v32 }
 0x100   : > { %1173 = vmatprep.subr.bf16.mxu1 %v1903_v30  ;;  %v2231_v30 = vld [vmem:[%s2707_s5 + $0xe4] ss:$8 sps:$4 sm:$0xff]  }
 0x101   : > { %1698 = vmatprep.subr.bf16.mxu0 %v2231_v30 }
 0x103   : > { %1174 = vmatpush1.bf16.msra.mxu1 %v1902_v33  ;;  %v2229_v33 = vld [vmem:[%s2707_s5 + $0xe0] ss:$8 sps:$4 sm:$0xff]  }
 0x104   : > { %1175 = vmatprep.subr.bf16.mxu1 %v1911_v34  ;;  %v1998_v34 = vcombine.low %v381_v25, %v385_v26  ;;  %1699 = vmatpush1.bf16.msra.mxu0 %v2229_v33  ;;  %v2255_v25 = vld [vmem:[%s2707_s5 + $0x164] ss:$8 sps:$4 sm:$0xff]   ;;  %v2253_v26 = vld [vmem:[%s2707_s5 + $0x160] ss:$8 sps:$4 sm:$0xff]  }
 0x105   : > { %1700 = vmatprep.subr.bf16.mxu0 %v2234_v36  ;;  %v2259_v33 = vld [vmem:[%s2707_s5 + $0x180] ss:$8 sps:$4 sm:$0xff]   ;;  %v2262_v36 = vld [vmem:[%s2707_s5 + $0x190] ss:$8 sps:$4 sm:$0xff]  }
 0x107   : > { %1176 = vmatpush1.bf16.msra.mxu1 %v1910_v37  ;;  %v397_v37 = vld [vmem:[%s2701_s27 + $0x3d8] sm:$0xff] }
 0x108   : > { %1177 = vmatprep.subr.bf16.mxu1 %v1919_v38  ;;  %v401_v38 = vld [vmem:[%s2701_s27 + $0x3f8] sm:$0xff]  ;;  %1701 = vmatpush1.bf16.msra.mxu0 %v2232_v39 }
 0x109   : > { %1713 = vmatprep.subr.bf16.mxu0 %v2237_v42  ;;  %v2270_v39 = vld [vmem:[%s2707_s5 + $0x1b4] ss:$8 sps:$4 sm:$0xff]  }
 0x10a   : > { %v2276_v42 = vld [vmem:[%s2707_s5 + $0x1d4] ss:$8 sps:$4 sm:$0xff]  }
 0x10b   : > { %1178 = vmatpush1.bf16.msra.mxu1 %v1918_v41  ;;  %v2015_v41 = vcombine.high %v397_v37, %v401_v38 }
 0x10c   : > { %1179 = vmatprep.subr.bf16.mxu1 %v1927_v47  ;;  %v2014_v47 = vcombine.low %v397_v37, %v401_v38  ;;  %v2267_v37 = vld [vmem:[%s2707_s5 + $0x1a4] ss:$8 sps:$4 sm:$0xff]   ;;  %v2265_v38 = vld [vmem:[%s2707_s5 + $0x1a0] ss:$8 sps:$4 sm:$0xff]  }
 0x10f   : > { %1180 = vmatpush1.bf16.msra.mxu1 %v1926_v44 }
 0x110   : > { %1181 = vmatprep.subr.bf16.mxu1 %v1935_v45 }
 0x113   : > { %1182 = vmatpush1.bf16.msra.mxu1 %v1934_v49 }
 0x114   : > { %1183 = vmatprep.subr.bf16.mxu1 %v1943_v50 }
 0x117   : > { %1184 = vmatpush1.bf16.msra.mxu1 %v1942_v55 }
 0x118   : > { %1185 = vmatprep.subr.bf16.mxu1 %v1951_v56 }
 0x11b   : > { %1186 = vmatpush1.bf16.msra.mxu1 %v1950_v61 }
 0x11c   : > { %1187 = vmatprep.subr.bf16.mxu1 %v1959_v62 }
 0x11f   : > { %1188 = vmatpush1.bf16.msra.mxu1 %v1958_v3 }
 0x120   : > { %1189 = vmatprep.subr.bf16.mxu1 %v1967_v4 }
 0x123   : > { %1190 = vmatpush1.bf16.msra.mxu1 %v1966_v9 }
 0x124   : > { %1191 = vmatprep.subr.bf16.mxu1 %v1975_v10 }
 0x127   : > { %1192 = vmatpush1.bf16.msra.mxu1 %v1974_v16  ;;  %v2238_v16 = vld [vmem:[%s2707_s5 + $0x110] ss:$8 sps:$4 sm:$0xff]  }
 0x128   : > { %1193 = vmatprep.subr.bf16.mxu1 %v1983_v17  ;;  %v2243_v17 = vld [vmem:[%s2707_s5 + $0x124] ss:$8 sps:$4 sm:$0xff]  }
 0x12b   : > { %1194 = vmatpush1.bf16.msra.mxu1 %v1982_v22  ;;  %v2247_v22 = vld [vmem:[%s2707_s5 + $0x140] ss:$8 sps:$4 sm:$0xff]  }
 0x12c   : > { %1195 = vmatprep.subr.bf16.mxu1 %v1991_v23  ;;  %v2252_v23 = vld [vmem:[%s2707_s5 + $0x154] ss:$8 sps:$4 sm:$0xff]  }
 0x12f   : > { %1196 = vmatpush1.bf16.msra.mxu1 %v1990_v28  ;;  %v2256_v28 = vld [vmem:[%s2707_s5 + $0x170] ss:$8 sps:$4 sm:$0xff]  }
 0x130   : > { %1197 = vmatprep.subr.bf16.mxu1 %v1999_v29  ;;  %v2261_v29 = vld [vmem:[%s2707_s5 + $0x184] ss:$8 sps:$4 sm:$0xff]  }
 0x133   : > { %1198 = vmatpush1.bf16.msra.mxu1 %v1998_v34 }
 0x134   : > { %1199 = vmatprep.subr.bf16.mxu1 %v2007_v35  ;;  %v2264_v35 = vld [vmem:[%s2707_s5 + $0x194] ss:$8 sps:$4 sm:$0xff]  }
 0x137   : > { %1200 = vmatpush1.bf16.msra.mxu1 %v2006_v40  ;;  %v2268_v40 = vld [vmem:[%s2707_s5 + $0x1b0] ss:$8 sps:$4 sm:$0xff]  }
 0x138   : > { %1201 = vmatprep.subr.bf16.mxu1 %v2015_v41  ;;  %v2273_v41 = vld [vmem:[%s2707_s5 + $0x1c4] ss:$8 sps:$4 sm:$0xff]  }
 0x13b   : > { %1202 = vmatpush1.bf16.msra.mxu1 %v2014_v47  ;;  %v2271_v47 = vld [vmem:[%s2707_s5 + $0x1c0] ss:$8 sps:$4 sm:$0xff]  }
 0x13e   : > { %1204 = vmatmul.mubr.bf16.vlgmr.msra.gmra.mrb[8].mxu1 %v2782_v11 }
 0x191   : > { %v1076_v43 = vpop.f32.mrb[0].mxu1  ;;  %v1162_v52 = vpop.f32.mrb[0].mxu0 }
 0x192   : > { %v2016_v44 = vmul.f32 -1.442695, %v1076_v43  ;;  %v1078_v45 = vpop.f32.mrb[1].mxu1  ;;  %v1164_v53 = vpop.f32.mrb[1].mxu0 }
 0x193   : > { %v2017_v46 = vmul.f32 -1.442695, %v1078_v45  ;;  %v1080_v48 = vpop.f32.mrb[2].mxu1  ;;  %v1166_v54 = vpop.f32.mrb[2].mxu0 }
 0x194   : > { %2283 = vpow2.f32 %v2016_v44  ;;  %v2020_v49 = vmul.f32 -1.442695, %v1080_v48  ;;  %v1082_v50 = vpop.f32.mrb[3].mxu1  ;;  %v1168_v55 = vpop.f32.mrb[3].mxu0  ;;  %v2279_v44 = vld [vmem:[%s2707_s5 + $0x1e4] ss:$8 sps:$4 sm:$0xff]  }
 0x195   : > { %2285 = vpow2.f32 %v2017_v46  ;;  %v2021_v51 = vmul.f32 -1.442695, %v1082_v50  ;;  %v2282_v46 = vld [vmem:[%s2707_s5 + $0x1f4] ss:$8 sps:$4 sm:$0xff]  }
 0x196   : > { %2287 = vpow2.f32 %v2020_v49 }
 0x197   : > { %2289 = vpow2.f32 %v2021_v51 }
 0x19e   : > { %v2284_v56 = vpop.eup %2283 }
 0x19f   : > { %v2286_v11 = vpop.eup %2285  ;;  %v1238_v57 = vadd.f32 1.0, %v2284_v56 }
 0x1a0   : > { %v2288_v58 = vpop.eup %2287  ;;  %v1239_v59 = vadd.f32 1.0, %v2286_v11 }
 0x1a1   : > { %v2290_v60 = vpop.eup %2289  ;;  %2291 = vrcp.f32 %v1238_v57  ;;  %v1242_v61 = vadd.f32 1.0, %v2288_v58 }
 0x1a2   : > { %2293 = vrcp.f32 %v1239_v59  ;;  %v1243_v62 = vadd.f32 1.0, %v2290_v60 }
 0x1a3   : > { %2295 = vrcp.f32 %v1242_v61 }
 0x1a4   : > { %2297 = vrcp.f32 %v1243_v62 }
 0x1ab   : > { %v2292_v63 = vpop.eup %2291 }
 0x1ac   : > { %v2294_v0 = vpop.eup %2293  ;;  %v1262_v1 = vmul.f32 %v2292_v63, %v1076_v43  ;;  %v2274_v43 = vld [vmem:[%s2707_s5 + $0x1d0] ss:$8 sps:$4 sm:$0xff]  }
 0x1ad   : > { %v2296_v2 = vpop.eup %2295  ;;  %v1263_v3 = vmul.f32 %v2294_v0, %v1078_v45  ;;  %v2277_v45 = vld [vmem:[%s2707_s5 + $0x1e0] ss:$8 sps:$4 sm:$0xff]  }
 0x1ae   : > { %v2298_v4 = vpop.eup %2297  ;;  %v1266_v5 = vmul.f32 %v2296_v2, %v1080_v48  ;;  %v1270_v6 = vmul.f32 %v1262_v1, %v1162_v52 }
 0x1af   : > { %v1267_v7 = vmul.f32 %v2298_v4, %v1082_v50  ;;  %v1271_v8 = vmul.f32 %v1263_v3, %v1164_v53  ;;  %v2280_v50 = vld [vmem:[%s2707_s5 + $0x1f0] ss:$8 sps:$4 sm:$0xff]  }
 0x1b0   : > { %v1274_v9 = vmul.f32 %v1266_v5, %v1166_v54 }
 0x1b1   : > { %v1275_v10 = vmul.f32 %v1267_v7, %v1168_v55 }
 0x1b2   : > { %v1282_v12 = vpack.c.bf16 %v1274_v9, %v1270_v6 }
 0x1b3   : > { %v1283_v13 = vpack.c.bf16 %v1275_v10, %v1271_v8 }
 0x1b5   : > { %1702 = vmatprep.mubr.bf16.mxu0 %v1283_v13 }
 0x1b6   : > { %1703 = vmatmul.mubr.bf16.vlgmr.msra.gmra.mrb[4].mxu0 %v1282_v12 }
 0x1b7   : > { %1714 = vmatpush1.bf16.msra.mxu0 %v2235_v14 }
 0x1b8   : > { %1715 = vmatprep.subr.bf16.mxu0 %v2240_v15  ;;  %v1278_v15 = vld [vmem:[#allocation8] sm:$0xff] }
 0x1bb   : > { %1716 = vmatpush1.bf16.msra.mxu0 %v2238_v16  ;;  %v1279_v16 = vld [vmem:[#allocation8 + $0x8] sm:$0xff] }
 0x1bc   : > { %1717 = vmatprep.subr.bf16.mxu0 %v2243_v17 }
 0x1bf   : > { %1718 = vmatpush1.bf16.msra.mxu0 %v2241_v18  ;;  %v1280_v18 = vld [vmem:[#allocation8 + $0x10] sm:$0xff] }
 0x1c0   : > { %1719 = vmatprep.subr.bf16.mxu0 %v2246_v19 }
 0x1c3   : > { %1720 = vmatpush1.bf16.msra.mxu0 %v2244_v20 }
 0x1c4   : > { %1721 = vmatprep.subr.bf16.mxu0 %v2249_v21  ;;  %v1281_v21 = vld [vmem:[#allocation8 + $0x18] sm:$0xff] }
 0x1c7   : > { %1722 = vmatpush1.bf16.msra.mxu0 %v2247_v22 }
 0x1c8   : > { %1723 = vmatprep.subr.bf16.mxu0 %v2252_v23 }
 0x1cb   : > { %1724 = vmatpush1.bf16.msra.mxu0 %v2250_v24 }
 0x1cc   : > { %1725 = vmatprep.subr.bf16.mxu0 %v2255_v25 }
 0x1cf   : > { %1726 = vmatpush1.bf16.msra.mxu0 %v2253_v26 }
 0x1d0   : > { %1727 = vmatprep.subr.bf16.mxu0 %v2258_v27 }
 0x1d1   : > { %v1119_v30 = vpop.f32.mrb[4].mxu1 }
 0x1d2   : > { %v1121_v31 = vpop.f32.mrb[5].mxu1  ;;  %v2018_v48 = vmul.f32 -1.442695, %v1119_v30 }
 0x1d3   : > { %v1123_v32 = vpop.f32.mrb[6].mxu1  ;;  %1728 = vmatpush1.bf16.msra.mxu0 %v2256_v28  ;;  %v2019_v49 = vmul.f32 -1.442695, %v1121_v31 }
 0x1d4   : > { %v1125_v34 = vpop.f32.mrb[7].mxu1  ;;  %1729 = vmatprep.subr.bf16.mxu0 %v2261_v29  ;;  %v2022_v51 = vmul.f32 -1.442695, %v1123_v32  ;;  %2299 = vpow2.f32 %v2018_v48 }
 0x1d5   : > { %v2023_v52 = vmul.f32 -1.442695, %v1125_v34  ;;  %2301 = vpow2.f32 %v2019_v49 }
 0x1d6   : > { %2303 = vpow2.f32 %v2022_v51 }
 0x1d7   : > { %1730 = vmatpush1.bf16.msra.mxu0 %v2259_v33  ;;  %2305 = vpow2.f32 %v2023_v52 }
 0x1d8   : > { %1731 = vmatprep.subr.bf16.mxu0 %v2264_v35 }
 0x1db   : > { %1732 = vmatpush1.bf16.msra.mxu0 %v2262_v36 }
 0x1dc   : > { %1733 = vmatprep.subr.bf16.mxu0 %v2267_v37 }
 0x1de   : > { %v2300_v53 = vpop.eup %2299 }
 0x1df   : > { %1734 = vmatpush1.bf16.msra.mxu0 %v2265_v38  ;;  %v2302_v54 = vpop.eup %2301  ;;  %v1240_v11 = vadd.f32 1.0, %v2300_v53 }
 0x1e0   : > { %1735 = vmatprep.subr.bf16.mxu0 %v2270_v39  ;;  %v2304_v55 = vpop.eup %2303  ;;  %v1241_v57 = vadd.f32 1.0, %v2302_v54 }
 0x1e1   : > { %v2306_v56 = vpop.eup %2305  ;;  %v1244_v58 = vadd.f32 1.0, %v2304_v55  ;;  %2307 = vrcp.f32 %v1240_v11 }
 0x1e2   : > { %v1245_v59 = vadd.f32 1.0, %v2306_v56  ;;  %2309 = vrcp.f32 %v1241_v57 }
 0x1e3   : > { %1736 = vmatpush1.bf16.msra.mxu0 %v2268_v40  ;;  %2311 = vrcp.f32 %v1244_v58 }
 0x1e4   : > { %1737 = vmatprep.subr.bf16.mxu0 %v2273_v41  ;;  %2313 = vrcp.f32 %v1245_v59 }
 0x1e7   : > { %1738 = vmatpush1.bf16.msra.mxu0 %v2271_v47 }
 0x1e8   : > { %1739 = vmatprep.subr.bf16.mxu0 %v2276_v42 }
 0x1eb   : > { %1740 = vmatpush1.bf16.msra.mxu0 %v2274_v43  ;;  %v2308_v60 = vpop.eup %2307 }
 0x1ec   : > { %1741 = vmatprep.subr.bf16.mxu0 %v2279_v44  ;;  %v2310_v61 = vpop.eup %2309  ;;  %v1264_v0 = vmul.f32 %v2308_v60, %v1119_v30 }
 0x1ed   : > { %v2312_v62 = vpop.eup %2311  ;;  %v1265_v1 = vmul.f32 %v2310_v61, %v1121_v31 }
 0x1ee   : > { %v2314_v63 = vpop.eup %2313  ;;  %v1268_v3 = vmul.f32 %v2312_v62, %v1123_v32 }
 0x1ef   : > { %1742 = vmatpush1.bf16.msra.mxu0 %v2277_v45  ;;  %v1269_v6 = vmul.f32 %v2314_v63, %v1125_v34 }
 0x1f0   : > { %1743 = vmatprep.subr.bf16.mxu0 %v2282_v46 }
 0x1f3   : > { %1744 = vmatpush1.bf16.msra.mxu0 %v2280_v50 }
 0x211   : > { %v1205_v2 = vpop.f32.mrb[8].mxu1 }
 0x212   : > { %v1272_v4 = vmul.f32 %v1264_v0, %v1205_v2  ;;  %v1207_v5 = vpop.f32.mrb[9].mxu1 }
 0x213   : > { %v1273_v7 = vmul.f32 %v1265_v1, %v1207_v5  ;;  %v1209_v8 = vpop.f32.mrb[10].mxu1 }
 0x214   : > { %v1276_v9 = vmul.f32 %v1268_v3, %v1209_v8  ;;  %v1211_v10 = vpop.f32.mrb[11].mxu1 }
 0x215   : > { %v1277_v12 = vmul.f32 %v1269_v6, %v1211_v10 }
 0x216   : > { %v1284_v13 = vpack.c.bf16 %v1276_v9, %v1272_v4 }
 0x217   : > { %v1285_v14 = vpack.c.bf16 %v1277_v12, %v1273_v7 }
 0x219   : > { %1745 = vmatprep.mubr.bf16.mxu0 %v1285_v14 }
 0x21a   : > { %1746 = vmatmul.mubr.bf16.vlgmr.msra.gmra.mrb[4].mxu0 %v1284_v13 }
 0x2ed   : > { %v1747_v17 = vpop.f32.mrb[4].mxu0 }
 0x2ee   : > { %v1756_v19 = vadd.f32 %v1747_v17, %v1278_v15  ;;  %v1749_v20 = vpop.f32.mrb[5].mxu0 }
 0x2ef   : > { %v1757_v22 = vadd.f32 %v1749_v20, %v1279_v16  ;;  %v1751_v23 = vpop.f32.mrb[6].mxu0 }
 0x2f0   : > { %1760 = vst [vmem:[#allocation8] sm:$0xff] %v1756_v19  ;;  %v1758_v24 = vadd.f32 %v1751_v23, %v1280_v18  ;;  %v1753_v25 = vpop.f32.mrb[7].mxu0 }
 0x2f1   : > { %1761 = vst [vmem:[#allocation8 + $0x8] sm:$0xff] %v1757_v22  ;;  %v1759_v26 = vadd.f32 %v1753_v25, %v1281_v21 }
 0x2f2   : > { %1762 = vst [vmem:[#allocation8 + $0x10] sm:$0xff] %v1758_v24 }
 0x2f3   : > { %1763 = vst [vmem:[#allocation8 + $0x18] sm:$0xff] %v1759_v26 }
 0x2f4   : > { %2416 = shalt.err (!%p2413_p2)
}
 0x2f5   : > { %s2417_s28 = scalar_lea.hbm %s2958_s3, 512 }
 0x2f6   : > { %p2418_p3 = scmp.ne.s32.totalorder %s2958_s3, %s2417_s28  ;;  %p2423_p12 = scmp.lt.u32.totalorder %s2417_s28, %s2958_s3 }
 0x2f8   : > { %p2419_p6 = pnand %p2418_p3, %p2125_p0 }
 0x2fa   : > { %p2420_p11 = pneg %p2419_p6 }
 0x2fc   : > { %p2425_p10 = pnand %p2423_p12, %p2420_p11 }
 0x2fe   : > { %2428 = shalt.err (!%p2425_p10)
}
 0x2ff   : > { %s2501_s8 = smov 256   ;;  %s2502_s11 = smov 16  }
 0x300   : > { %2108 = dma.vmem_to_hbm [thread:$0]  (%p2125_p0), %s1775_s6, 512, %s2958_s3, [#allocation4], %s2501_s8, %s2501_s8, %s2502_s11  }
 0x301   : > { %2462 = dma.done.wait (%p2125_p0), [#allocation4], 512  }
 0x302   : > { %2464 = vsyncadd (%p2125_p0), [#allocation4], 4294966784 }
 0x303 PF: > { %s18_s17 = sadd.s32 1, %s2487_s17   ;;  %s2976_s12 = smov %s2471_s13 }
 0x304   : > { %p15_p9 = scmp.ge.s32.totalorder %s18_s17, 4   ;;  %s2977_s13 = smov %s2475_s14 }
 0x305   : > { %s2978_s14 = smov %s2567_s24  ;;  %s2979_s15 = smov %s2483_s16 }
 0x306   : > { %s2980_s16 = smov %s2982_s18  ;;  %17 = sbr.rel (!%p15_p9) target bundleno = 6 (0x6), region = 91 }
 0x30d   :  { %1790 = vsyncpa [#allocation3], 1 }
 0x30e   :  { %1792 = vsyncpa [#allocation3 + $0x1], 1 }
 0x30f   :  { %1793 = vsyncpa [#allocation6], 1 }
 0x310   :  { %1795 = vsyncpa [#allocation6 + $0x1], 1 }
 0x311   :  { %1796 = vsyncpa [#allocation4], 1 }
 0x312   :  { %1798 = vsyncpa [#allocation4 + $0x1], 1 }

</bundles_post_ra>
